<compile_context>
chip_gen: v6e
topology: v6e:2x2x1
jax: 0.10.0
libtpu: 0.0.40
codegen_flags: <defaults>
</compile_context>

<pallas_src>
import functools

import jax
import jax.numpy as jnp
from jax.experimental import pallas as pl
from jax.experimental.pallas import tpu as pltpu


def _partial_loss_kernel(d_ref, y_ref, o_ref, *, tile_rows, total_rows):
    """One tile: per-element loss term, reduced to an (8, 128) partial-sum slab."""
    d = d_ref[...].astype(jnp.float32)
    y = y_ref[...].astype(jnp.float32)
    diff = d - y
    per_elem = diff * diff                     # <- subclass-specific body (MSE)

    feat = d_ref.shape[1]
    # Fold lane groups: (TB, feat) -> (TB, feat//128, 128) -> (TB, 128).
    # Tile-aligned reshape; pure VPU adds.
    lanes = per_elem.reshape(tile_rows, feat // 128, 128).sum(axis=1)

    # Mask rows past the logical batch (tail tile of a non-divisible batch).
    row = (pl.program_id(0) * tile_rows
           + jax.lax.broadcasted_iota(jnp.int32, (tile_rows, 128), 0))
    lanes = jnp.where(row < total_rows, lanes, 0.0)

    # Fold sublane groups: (TB, 128) -> (TB//8, 8, 128) -> (8, 128).
    # Final cross-lane/sublane reduce + 1/N scale are deferred to the wrapper.
    o_ref[0] = lanes.reshape(tile_rows // 8, 8, 128).sum(axis=0)


def _round_up(x: int, m: int) -> int:
    return (x + m - 1) // m * m


def _choose_tile_rows(batch: int, feat: int, itemsize: int, requested):
    # sublane alignment: 8 rows for f32, 16 for bf16, 32 for 8-bit dtypes
    align = 8 * max(1, 4 // itemsize)
    if requested is not None:
        assert requested % align == 0, (requested, align)
        return requested
    # target ~2 MiB per input block (x2 inputs x2 pipeline buffers ~= 8 MiB VMEM)
    target_bytes = 2 * 1024 * 1024
    tb = max(align, min(2048, target_bytes // max(1, feat * itemsize)))
    tb = (tb // align) * align
    tb = min(tb, _round_up(batch, align))
    return max(align, tb)


def loss_calculator(distance: jax.Array, y: jax.Array, *, tile_rows=None) -> jax.Array:
    """Pallas implementation of a concrete AbstractLossCalculator.forward."""
    assert distance.shape == y.shape and distance.ndim == 2
    batch, feat = distance.shape
    # TODO(synk): pad/reshape non-lane-dense feature dims instead of asserting.
    assert feat % 128 == 0, "feature dim must be a multiple of 128 (lane-dense)"

    itemsize = jnp.dtype(distance.dtype).itemsize
    tb = _choose_tile_rows(batch, feat, itemsize, tile_rows)
    num_tiles = pl.cdiv(batch, tb)

    tile_bytes = tb * feat * itemsize
    vmem_limit = int(min(max(6 * tile_bytes + (1 << 20), 16 * 2**20), 48 * 2**20))

    kernel = functools.partial(_partial_loss_kernel, tile_rows=tb, total_rows=batch)

    partials = pl.pallas_call(
        kernel,
        out_shape=jax.ShapeDtypeStruct((num_tiles, 8, 128), jnp.float32),
        grid_spec=pltpu.PrefetchScalarGridSpec(
            num_scalar_prefetch=0,
            grid=(num_tiles,),
            in_specs=[
                pl.BlockSpec((tb, feat), lambda i: (i, 0)),
                pl.BlockSpec((tb, feat), lambda i: (i, 0)),
            ],
            out_specs=pl.BlockSpec((1, 8, 128), lambda i: (i, 0, 0)),
        ),
        compiler_params=pltpu.CompilerParams(
            dimension_semantics=("parallel",),
            vmem_limit_bytes=vmem_limit,
        ),
        cost_estimate=pl.CostEstimate(
            flops=3 * batch * feat,
            transcendentals=0,
            bytes_accessed=2 * batch * feat * itemsize + num_tiles * 8 * 128 * 4,
        ),
    )(distance, y)

    # Tiny final reduction + normalization (full logical element count).
    return jnp.sum(partials) / (batch * feat)


if __name__ == "__main__":
    key = jax.random.PRNGKey(0)
    k1, k2, k3, k4 = jax.random.split(key, 4)

    # Test 1: small f32 case, tile divides the batch evenly.
    b1, f1 = 32, 128
    d1 = jax.random.normal(k1, (b1, f1), dtype=jnp.float32)
    y1 = (jax.random.uniform(k2, (b1, f1)) > 0.5).astype(jnp.float32)
    loss1 = loss_calculator(d1, y1, tile_rows=16)
    jax.block_until_ready(loss1)
    ref1 = jnp.mean((d1 - y1) ** 2)
    assert jnp.allclose(loss1, ref1, rtol=1e-5, atol=1e-6), (loss1, ref1)

    # Test 2: batch not a multiple of the tile -> exercises tail-row masking
    # and the multi-tile parallel grid.
    b2, f2 = 40, 256
    d2 = jax.random.normal(k3, (b2, f2), dtype=jnp.float32)
    y2 = jax.random.normal(k4, (b2, f2), dtype=jnp.float32)
    loss2 = loss_calculator(d2, y2, tile_rows=16)
    jax.block_until_ready(loss2)
    ref2 = jnp.mean((d2 - y2) ** 2)
    assert jnp.allclose(loss2, ref2, rtol=1e-5, atol=1e-6), (loss2, ref2)

    # Test 3: bf16 inputs (halves HBM traffic), f32 accumulation in-kernel.
    d3 = d2.astype(jnp.bfloat16)
    y3 = y2.astype(jnp.bfloat16)
    loss3 = loss_calculator(d3, y3, tile_rows=16)
    jax.block_until_ready(loss3)
    ref3 = jnp.mean((d3.astype(jnp.float32) - y3.astype(jnp.float32)) ** 2)
    assert jnp.allclose(loss3, ref3, rtol=1e-2, atol=1e-2), (loss3, ref3)

    print("KERNEL_OK")
</pallas_src>

<mosaic_0001>
module attributes {stable_mosaic.version = 11 : i64} {
  func.func @_partial_loss_kernel(%arg0: i32, %arg1: memref<16x128xf32, #tpu.memory_space<vmem>>, %arg2: memref<16x128xf32, #tpu.memory_space<vmem>>, %arg3: memref<1x8x128xf32, #tpu.memory_space<vmem>>) attributes {dimension_semantics = [#tpu.dimension_semantics<parallel>], iteration_bounds = array<i64: 2>, scalar_prefetch = 0 : i64, scratch_operands = 0 : i64, tpu.core_type = #tpu.core_type<tc>, window_params = [{transform_indices = @transform_0, window_bounds = array<i64: 16, 128>}, {transform_indices = @transform_1, window_bounds = array<i64: 16, 128>}, {transform_indices = @transform_2, window_bounds = array<i64: 1, 8, 128>}]} {
    %c0 = arith.constant 0 : index
    %c0_0 = arith.constant 0 : index
    %0 = vector.load %arg1[%c0, %c0_0] : memref<16x128xf32, #tpu.memory_space<vmem>>, vector<16x128xf32>
    %c0_1 = arith.constant 0 : index
    %c0_2 = arith.constant 0 : index
    %1 = vector.load %arg2[%c0_1, %c0_2] : memref<16x128xf32, #tpu.memory_space<vmem>>, vector<16x128xf32>
    %2 = arith.subf %0, %1 : vector<16x128xf32>
    %3 = arith.mulf %2, %2 : vector<16x128xf32>
    %4 = vector.shape_cast %3 : vector<16x128xf32> to vector<16x1x128xf32>
    %cst = arith.constant dense<0.000000e+00> : vector<16x128xf32>
    %5 = vector.multi_reduction <add>, %4, %cst [1] : vector<16x1x128xf32> to vector<16x128xf32>
    %c16_i32 = arith.constant 16 : i32
    %6 = arith.muli %arg0, %c16_i32 : i32
    %7 = tpu.iota {dimensions = array<i32: 0>} : vector<16x128xi32>
    %8 = vector.broadcast %6 : i32 to vector<16x128xi32>
    %9 = arith.addi %8, %7 : vector<16x128xi32>
    %c32_i32 = arith.constant 32 : i32
    %10 = vector.broadcast %c32_i32 : i32 to vector<16x128xi32>
    %11 = arith.cmpi slt, %9, %10 : vector<16x128xi32>
    %cst_3 = arith.constant 0.000000e+00 : f32
    %12 = vector.broadcast %cst_3 : f32 to vector<16x128xf32>
    %13 = arith.select %11, %5, %12 : vector<16x128xi1>, vector<16x128xf32>
    %14 = vector.shape_cast %13 : vector<16x128xf32> to vector<2x8x128xf32>
    %cst_4 = arith.constant dense<0.000000e+00> : vector<8x128xf32>
    %15 = vector.multi_reduction <add>, %14, %cst_4 [0] : vector<2x8x128xf32> to vector<8x128xf32>
    %c0_5 = arith.constant 0 : index
    %c0_6 = arith.constant 0 : index
    %c0_7 = arith.constant 0 : index
    %16 = vector.load %arg3[%c0_5, %c0_6, %c0_7] : memref<1x8x128xf32, #tpu.memory_space<vmem>>, vector<1x8x128xf32>
    %17 = vector.shape_cast %16 : vector<1x8x128xf32> to vector<8x128xf32>
    %18 = vector.shape_cast %15 : vector<8x128xf32> to vector<1x8x128xf32>
    tpu.vector_store %arg3[%c0_5, %c0_6, %c0_7], %18 {strides = array<i32>} : memref<1x8x128xf32, #tpu.memory_space<vmem>>, vector<1x8x128xf32>,
    return
  }
  func.func @transform_0(%arg0: i32) -> (i32, i32) {
    %c0_i32 = arith.constant 0 : i32
    %c0_i32_0 = arith.constant 0 : i32
    return %arg0, %c0_i32 : i32, i32
  }
  func.func @transform_1(%arg0: i32) -> (i32, i32) {
    %c0_i32 = arith.constant 0 : i32
    %c0_i32_0 = arith.constant 0 : i32
    return %arg0, %c0_i32 : i32, i32
  }
  func.func @transform_2(%arg0: i32) -> (i32, i32, i32) {
    %c0_i32 = arith.constant 0 : i32
    %c0_i32_0 = arith.constant 0 : i32
    %c0_i32_1 = arith.constant 0 : i32
    return %arg0, %c0_i32, %c0_i32_0 : i32, i32, i32
  }
}

</mosaic_0001>

<bundles_post_ra>
// kernel: tpu_custom_call.1
= control target key start
LH: loop header
LB: loop body
LE: loop exit
PB: predicated region body
PF: predicated region fallthrough
CT: control target
= control target key end

     0   :  { %7 = vsyncpa [#allocation3], 0  ;;  %s759_s0 = inlined_call_operand.hbm [shape: f32[32,128], index: 0, kind: input, shape index: {}]   ;;  %s760_s1 = inlined_call_operand.hbm [shape: f32[32,128], index: 1, kind: input, shape index: {}]   ;;  %s761_s2 = inlined_call_operand.hbm [shape: f32[2,8,128], index: 2, kind: output, shape index: {}]  }
   0x1   :  { %9 = vsyncpa [#allocation3 + $0x1], 0 }
   0x2   :  { %10 = vsyncpa [#allocation6], 0 }
   0x3   :  { %12 = vsyncpa [#allocation6 + $0x1], 0 }
   0x4   :  { %13 = vsyncpa [#allocation4], 0 }
   0x5   :  { %15 = vsyncpa [#allocation4 + $0x1], 0  ;;  %s553_s9 = smov 0   ;;  %s555_s10 = smov 0  }
   0x6   :  { %s557_s11 = smov 0   ;;  %s559_s12 = smov 0  }
   0x7 LB: > { %s574_s13 = sadd.s32 4294967295, %s531_s12   ;;  %s334_s14 = sadd.s32 4294967294, %s531_s12   ;;  %s531_s12 = sphi %s559_s12, %s777_s12   ;;  %s527_s11 = sphi %s557_s11, %s776_s11   ;;  %s523_s10 = sphi %s555_s10, %s775_s10   ;;  %s519_s9 = sphi %s553_s9, %s774_s9  }
   0x8   : > { %s578_s15 = sadd.s32 1, %s531_s12   ;;  %s28_s16 = sadd.s32 1, %s527_s11 }
   0x9   : > { %s25_s17 = ssub.s32 %s531_s12, %s578_s15  ;;  %p35_p0 = scmp.ne.s32.totalorder %s527_s11, %s523_s10 }
   0xa   : > { %p26_p1 = scmp.eq.s32.totalorder %s25_s17, 0  ;;  %p36_p2 = scmp.eq.s32.totalorder %s531_s12, 0 }
   0xb   : > { %p41_p3 = scmp.ne.s32.totalorder %s523_s10, %s519_s9  ;;  %p42_p4 = scmp.eq.s32.totalorder %s574_s13, 0 }
   0xc   : > { %s590_s18 = scalar_select %p26_p1, %s527_s11, %s28_s16  }
   0xd   : > { %p592_p5 = por %p36_p2, %p35_p0  ;;  %p596_p6 = por %p42_p4, %p41_p3 }
   0xe   : > { %p91_p7 = scmp.eq.s32.totalorder %s574_s13, 1  ;;  %p97_p8 = scmp.eq.s32.totalorder %s334_s14, 1 }
   0xf   : > { %s765_s20 = scalar_select %p596_p6, 1, 0 }
  0x10   : > { %p371_p10 = scmp.lt.s32.totalorder %s531_s12, 2  ;;  %p603_p11 = por %p91_p7, %p35_p0 }
  0x11   : > { %p607_p12 = por %p97_p8, %p41_p3  ;;  %s612_s23 = sand.u32 1, %s527_s11  }
  0x12   : > { %s766_s21 = scalar_select %p603_p11, 1, 0 }
  0x13   : > { %s767_s22 = scalar_select %p607_p12, 1, 0 }
  0x14   : > { %s352_s24 = sshll.u32 %s531_s12, 8  ;;  %s337_s25 = sshll.u32 %s612_s23, 4 }
  0x15   : > { %s621_s28 = scalar_lea.hbm %s759_s0, %s352_s24  ;;  %s121_s29 = scalar_lea.vmem [#allocation2], %s337_s25 }
  0x16   : > { %s128_s30 = sshll.u32 %s121_s29, 4  ;;  %p627_p13 = pnand %p371_p10, %p592_p5  ;;  %s631_s30 = int_to_ptr.vmem [resolvable:$true] %s128_s30 }
  0x17   : > { %s118_s4 = scalar_lea.sflag [#allocation3], %s612_s23  ;;  %s407_s5 = scalar_lea.hbm %s621_s28, 256 }
  0x18   : > { %p408_p0 = scmp.ne.s32.totalorder %s621_s28, %s407_s5  ;;  %p409_p1 = pneg %p627_p13 }
  0x19   : > { %s412_s8 = scalar_lea.hbm %s759_s0, 512  ;;  %p413_p4 = scmp.lt.s32.totalorder %s621_s28, %s759_s0 }
  0x1a   : > { %p410_p2 = pnand %p409_p1, %p408_p0  ;;  %p414_p5 = scmp.lt.s32.totalorder %s412_s8, %s407_s5 }
  0x1c   : > { %p411_p3 = pneg %p410_p2  ;;  %p415_p7 = por %p414_p5, %p413_p4 }
  0x1e   : > { %p416_p8 = pnand %p415_p7, %p411_p3 }
  0x20   : > { %419 = shalt.err (!%p416_p8)
}
  0x21   : > { %s420_s17 = scalar_lea.vmem %s631_s30, 256  ;;  %s533_s19 = smov [#allocation2]  }
  0x22   : > { %p421_p10 = scmp.ne.s32.totalorder %s631_s30, %s420_s17  ;;  %s425_s26 = sshll.u32 %s533_s19, 4  ;;  %s426_s26 = int_to_ptr.vmem [resolvable:$false] %s425_s26 }
  0x23   : > { %s427_s27 = scalar_lea.vmem %s426_s26, 512  ;;  %p428_p9 = scmp.lt.s32.totalorder %s631_s30, %s426_s26 }
  0x24   : > { %p423_p0 = pnand %p421_p10, %p409_p1  ;;  %p429_p12 = scmp.lt.s32.totalorder %s427_s27, %s420_s17 }
  0x26   : > { %p424_p2 = pneg %p423_p0  ;;  %p430_p11 = por %p429_p12, %p428_p9 }
  0x28   : > { %p431_p4 = pnand %p430_p11, %p424_p2 }
  0x2a   : > { %434 = shalt.err (!%p431_p4)
}
  0x2b   : > { %s534_s29 = smov 128   ;;  %s535_s5 = smov 8  }
  0x2c   : > { %363 = dma.hbm_to_vmem [thread:$0]  (!%p627_p13), %s621_s28, 256, %s631_s30, %s118_s4, %s534_s29, %s534_s29, %s535_s5  }
  0x2d   : > { %p343_p9 = scmp.ge.s32.totalorder %s531_s12, 1  ;;  %p157_p11 = scmp.lt.s32.totalorder %s531_s12, 3 }
  0x2e   : > { %s674_s14 = scalar_lea.hbm %s760_s1, %s352_s24  ;;  %s142_s16 = scalar_lea.vmem [#allocation5], %s337_s25 }
  0x2f   : > { %p665_p12 = pnand %p343_p9, %p157_p11  ;;  %s149_s17 = sshll.u32 %s142_s16, 4  ;;  %s678_s17 = int_to_ptr.vmem [resolvable:$true] %s149_s17 }
  0x30   : > { %s139_s28 = scalar_lea.sflag [#allocation6], %s612_s23  ;;  %s435_s30 = scalar_lea.hbm %s674_s14, 256 }
  0x31   : > { %p436_p3 = scmp.ne.s32.totalorder %s674_s14, %s435_s30  ;;  %s440_s24 = scalar_lea.hbm %s760_s1, 512 }
  0x32   : > { %p441_p8 = scmp.lt.s32.totalorder %s674_s14, %s760_s1  ;;  %p442_p10 = scmp.lt.s32.totalorder %s440_s24, %s435_s30 }
  0x33   : > { %p438_p5 = pnand %p436_p3, %p409_p1 }
  0x34   : > { %p443_p0 = por %p442_p10, %p441_p8 }
  0x35   : > { %p439_p7 = pneg %p438_p5 }
  0x37   : > { %p444_p2 = pnand %p443_p0, %p439_p7 }
  0x39   : > { %447 = shalt.err (!%p444_p2)
}
  0x3a   : > { %s448_s23 = scalar_lea.vmem %s678_s17, 256  ;;  %s536_s25 = smov [#allocation5]  }
  0x3b   : > { %p449_p4 = scmp.ne.s32.totalorder %s678_s17, %s448_s23  ;;  %s453_s7 = sshll.u32 %s536_s25, 4  ;;  %s454_s7 = int_to_ptr.vmem [resolvable:$false] %s453_s7 }
  0x3c   : > { %s455_s8 = scalar_lea.vmem %s454_s7, 512  ;;  %p456_p3 = scmp.lt.s32.totalorder %s678_s17, %s454_s7 }
  0x3d   : > { %p451_p9 = pnand %p449_p4, %p409_p1  ;;  %p457_p5 = scmp.lt.s32.totalorder %s455_s8, %s448_s23 }
  0x3f   : > { %p452_p11 = pneg %p451_p9  ;;  %p458_p6 = por %p457_p5, %p456_p3 }
  0x41   : > { %p459_p8 = pnand %p458_p6, %p452_p11 }
  0x43   : > { %462 = shalt.err (!%p459_p8)
}
  0x44   : > { %366 = dma.hbm_to_vmem [thread:$0]  (!%p627_p13), %s674_s14, 256, %s678_s17, %s139_s28, %s534_s29, %s534_s29, %s535_s5  }
  0x45   : > { %161 = sbr.rel (%p665_p12) target bundleno = 103 (0x67), region = 28  ;;  %s709_s16 = sand.u32 (!%p665_p12), 1, %s523_s10  }
  0x46   : > { %s344_s30 = sshll.u32 (!%p665_p12), %s709_s16, 4  ;;  %s164_s4 = scalar_lea.sflag (!%p665_p12), [#allocation3], %s709_s16 }
  0x47   : > { %s167_s19 = scalar_lea.vmem (!%p665_p12), [#allocation2], %s344_s30  ;;  %p770_p6 = scmp.ne.s32.totalorder (!%p665_p12), %s765_s20, 0 }
  0x4a   : > { %506 = dma.done.wait (%p770_p6), %s164_s4, 256  }
  0x4b   : > { %508 = vsyncadd (%p770_p6), %s164_s4, 4294967040  ;;  %s173_s3 = scalar_lea.sflag [#allocation6], %s709_s16  ;;  %s176_s29 = scalar_lea.vmem [#allocation5], %s344_s30 }
  0x4c   : > { %510 = dma.done.wait (%p770_p6), %s173_s3, 256  }
  0x4d   : > { %512 = vsyncadd (%p770_p6), %s173_s3, 4294967040  ;;  %s347_s5 = sshll.u32 %s574_s13, 4  ;;  %v215_v0 = vlaneseq  ;;  %s346_s6 = sshll.u32 %s709_s16, 3  ;;  %v204_v6 = vld [vmem:[%s167_s19] sm:$0xff]  ;;  %v205_v7 = vld [vmem:[%s167_s19 + $0x8] sm:$0xff] }
  0x4e   : > { %v218_v2 = vstv %s347_s5  ;;  %v206_v8 = vld [vmem:[%s176_s29] sm:$0xff]  ;;  %v207_v9 = vld [vmem:[%s176_s29 + $0x8] sm:$0xff]  ;;  %s201_s20 = scalar_lea.vmem [#allocation7], %s346_s6  ;;  %s349_s17 = sshll.u32 %s574_s13, 7 }
  0x4f   : > { %v216_v1 = vshrl.u32 %v215_v0, 7  ;;  %v208_v10 = vsub.f32 %v204_v6, %v206_v8  ;;  %v209_v11 = vsub.f32 %v205_v7, %v207_v9  ;;  %s241_s14 = sshll.u32 %s201_s20, 4  ;;  %s239_s26 = scalar_lea.hbm %s761_s2, %s349_s17  ;;  %s242_s14 = int_to_ptr.vmem [resolvable:$true] %s241_s14 }
  0x50   : > { %s228_s27 = scalar_lea.sflag [#allocation4], %s709_s16  ;;  %s463_s23 = scalar_lea.vmem %s242_s14, 128 }
  0x51   : > { %v217_v3 = vadd.s32 8, %v216_v1  ;;  %v219_v4 = vadd.s32 %v218_v2, %v216_v1  ;;  %v210_v12 = vmul.f32 %v208_v10, %v208_v10  ;;  %v211_v13 = vmul.f32 %v209_v11, %v209_v11  ;;  %p464_p13 = scmp.ne.s32.totalorder %s242_s14, %s463_s23  ;;  %p771_p1 = scmp.ne.s32.totalorder %s766_s21, 0 }
  0x52   : > { %s537_s25 = smov [#allocation7]  }
  0x53   : > { %v220_v5 = vadd.s32 %v218_v2, %v217_v3  ;;  %vm221_vm0 = vcmp.lt.s32.totalorder %v219_v4, 32  ;;  %p465_p12 = pnand %p464_p13, %p771_p1  ;;  %s467_s7 = sshll.u32 %s537_s25, 4  ;;  %s468_s7 = int_to_ptr.vmem [resolvable:$false] %s467_s7 }
  0x54   : > { %v223_v14 = vsel %vm221_vm0, %v210_v12, 0.0  ;;  %s469_s8 = scalar_lea.vmem %s468_s7, 256  ;;  %p470_p10 = scmp.lt.s32.totalorder %s242_s14, %s468_s7 }
  0x55   : > { %vm222_vm1 = vcmp.lt.s32.totalorder %v220_v5, 32  ;;  %p466_p7 = pneg %p465_p12  ;;  %p471_p0 = scmp.lt.s32.totalorder %s469_s8, %s463_s23 }
  0x56   : > { %v224_v15 = vsel %vm222_vm1, %v211_v13, 0.0 }
  0x57   : > { %v225_v16 = vadd.f32 %v224_v15, %v223_v14  ;;  %p472_p2 = por %p471_p0, %p470_p10 }
  0x59   : > { %226 = vst [vmem:[%s201_s20] sm:$0xff] %v225_v16  ;;  %p473_p4 = pnand %p472_p2, %p466_p7 }
  0x5b   : > { %476 = shalt.err (!%p473_p4)
}
  0x5c   : > { %s477_s13 = scalar_lea.hbm %s239_s26, 128  ;;  %s481_s4 = scalar_lea.hbm %s761_s2, 256 }
  0x5d   : > { %p478_p9 = scmp.ne.s32.totalorder %s239_s26, %s477_s13  ;;  %p482_p5 = scmp.lt.s32.totalorder %s239_s26, %s761_s2 }
  0x5e   : > { %p483_p8 = scmp.lt.s32.totalorder %s481_s4, %s477_s13 }
  0x5f   : > { %p479_p11 = pnand %p478_p9, %p771_p1 }
  0x60   : > { %p484_p6 = por %p483_p8, %p482_p5 }
  0x61   : > { %p480_p3 = pneg %p479_p11 }
  0x63   : > { %p485_p13 = pnand %p484_p6, %p480_p3 }
  0x65   : > { %488 = shalt.err (!%p485_p13)
}
  0x66   : > { %358 = dma.vmem_to_hbm [thread:$0]  (%p771_p1), %s242_s14, 128, %s239_s26, %s228_s27  }
  0x67 PF: > { %s253_s29 = sand.u32 1, %s519_s9   ;;  %p772_p12 = scmp.ne.s32.totalorder %s767_s22, 0 }
  0x68   : > { %p773_p7 = scmp.ge.s32.totalorder %s531_s12, 2  ;;  %s254_s5 = scalar_lea.sflag [#allocation4], %s253_s29 }
  0x6a   : > { %p368_p10 = pnand %p773_p7, %p772_p12 }
  0x6c   : > { %p369_p0 = pneg %p368_p10 }
  0x6e   : > { %514 = dma.done.wait (%p369_p0), %s254_s5, 128  }
  0x6f   : > { %516 = vsyncadd (%p369_p0), %s254_s5, 4294967168  ;;  %p18_p2 = scmp.ge.s32.totalorder %s578_s15, 4   ;;  %s774_s9 = smov %s523_s10 }
  0x70   : > { %s775_s10 = smov %s527_s11  ;;  %s776_s11 = smov %s590_s18 }
  0x71   : > { %s777_s12 = smov %s578_s15  ;;  %20 = sbr.rel (!%p18_p2) target bundleno = 7 (0x7), region = 86 }
  0x76   :  { %259 = vsyncpa [#allocation3], 1 }
  0x77   :  { %261 = vsyncpa [#allocation3 + $0x1], 1 }
  0x78   :  { %262 = vsyncpa [#allocation6], 1 }
  0x79   :  { %264 = vsyncpa [#allocation6 + $0x1], 1 }
  0x7a   :  { %265 = vsyncpa [#allocation4], 1 }
  0x7b   :  { %267 = vsyncpa [#allocation4 + $0x1], 1 }

</bundles_post_ra>
